<compile_context>
chip_gen: v7x
topology: tpu7x:2x2x1
jax: 0.10.0
libtpu: 0.0.40
codegen_flags: <defaults>
</compile_context>

<pallas_src>
import jax
import jax.numpy as jnp
from jax.experimental import pallas as pl
from jax.experimental.pallas import tpu as pltpu

HIDDEN = 128
STATE = 2 * HIDDEN      # 256  ([h | c] packed on the lane axis)
GATES = 4 * HIDDEN      # 512  (i, f, g, o)


def _decoder_rollout_kernel(x_ref, state_ref, w_ref, aux_ref,
                            y_ref, state_out_ref,
                            xh_sc, c_sc):
    """One grid step == one LSTMCell step + (ReLU -> 1x1 conv -> Sigmoid).

    Grid: (T,)  -- time, "arbitrary" (recurrence).
    Refs (per step):
      x_ref:         (1, B, 128)   this step's input block
      state_ref:     (B, 256)      [h0 | c0]   (resident, read at t == 0 only)
      w_ref:         (256, 512)    concat([W_ih^T, W_hh^T], 0) (resident, bf16)
      aux_ref:       (8, 512)      row0 = b_ih+b_hh, row1[:128] = conv W,
                                   row2[0] = conv b                   (resident)
      y_ref:         (1, B, 1)     this step's sigmoid output block
      state_out_ref: (B, 256)      [h_T | c_T]  (resident, written at last step)
    Scratch (persist across grid steps):
      xh_sc:         (B, 256)      [x_t | h_{t-1}] matmul operand
      c_sc:          (B, 128)      carried cell state
    """
    t = pl.program_id(0)
    last = pl.num_programs(0) - 1

    # Initialize the carried state from the resident initial-state tile.
    @pl.when(t == 0)
    def _():
        xh_sc[:, HIDDEN:] = state_ref[:, :HIDDEN]      # h0
        c_sc[...] = state_ref[:, HIDDEN:]               # c0

    # This step's input goes into the left half of the persistent [x | h] tile.
    xh_sc[:, :HIDDEN] = x_ref[0]

    # Single fused gate matmul: (B, 256) @ (256, 512) -> (B, 512), f32 accum.
    # (On v5e two K=128 matmuls would fit its 128-wide MXU equally well.)
    gates = jnp.dot(xh_sc[...].astype(w_ref.dtype), w_ref[...],
                    preferred_element_type=jnp.float32) + aux_ref[0:1, :]

    # PyTorch LSTMCell gate order: i, f, g, o.
    i_g = jax.nn.sigmoid(gates[:, 0 * HIDDEN:1 * HIDDEN])
    f_g = jax.nn.sigmoid(gates[:, 1 * HIDDEN:2 * HIDDEN])
    g_g = jnp.tanh(gates[:, 2 * HIDDEN:3 * HIDDEN])
    o_g = jax.nn.sigmoid(gates[:, 3 * HIDDEN:4 * HIDDEN])

    c_new = f_g * c_sc[...] + i_g * g_g
    h_new = o_g * jnp.tanh(c_new)

    # Carry state in VMEM for the next step.
    c_sc[...] = c_new
    xh_sc[:, HIDDEN:] = h_new

    # Decoder head: Dropout(0.1) is identity in eval mode, then ReLU, then the
    # 1x1 Conv1d (a 128 -> 1 linear) as VPU multiply + lane reduce, then Sigmoid.
    # TODO(synk): Dropout(0.1) implemented as identity (inference/eval mode only).
    a = jnp.maximum(h_new, 0.0)
    y = (jnp.sum(a * aux_ref[1:2, :HIDDEN], axis=-1, keepdims=True)
         + aux_ref[2:3, 0:1])
    y_ref[0] = jax.nn.sigmoid(y)

    # Flush the final state once.
    @pl.when(t == last)
    def _():
        state_out_ref[:, :HIDDEN] = h_new
        state_out_ref[:, HIDDEN:] = c_new


def prepare_params(w_ih, w_hh, b_ih, b_hh, conv_w, conv_b, use_bf16=True):
    """One-time weight prep (hoisted out of the per-step path).

    Args (PyTorch layout):
      w_ih: (512, 128), w_hh: (512, 128), b_ih/b_hh: (512,)
      conv_w: (1, 128, 1), conv_b: (1,)
    Returns:
      w_fused: (256, 512) bf16/f32 -- concat([W_ih^T, W_hh^T], 0)
      aux:     (8, 512)   f32     -- row0 = b_ih+b_hh, row1[:128] = conv W,
                                      row2[0] = conv b
    """
    wdt = jnp.bfloat16 if use_bf16 else jnp.float32
    w_fused = jnp.concatenate(
        [jnp.transpose(w_ih), jnp.transpose(w_hh)], axis=0).astype(wdt)
    aux = jnp.zeros((8, GATES), jnp.float32)
    aux = aux.at[0, :].set((b_ih + b_hh).astype(jnp.float32))
    aux = aux.at[1, :HIDDEN].set(conv_w.reshape(HIDDEN).astype(jnp.float32))
    aux = aux.at[2, 0].set(conv_b.reshape(())[()].astype(jnp.float32))
    return w_fused, aux


@jax.jit
def decoder_rollout(xs, state0, w_fused, aux):
    """T-step rollout of the Decoder.

    Args:
      xs:     (T, B, 128) f32 per-step inputs
      state0: (B, 256)    f32 initial [h | c]
    Returns:
      ys:     (T, B, 1)   f32 sigmoid outputs
      state:  (B, 256)    f32 final [h | c]
    """
    T, B, _ = xs.shape
    ys, state_out = pl.pallas_call(
        _decoder_rollout_kernel,
        grid=(T,),
        in_specs=[
            pl.BlockSpec((1, B, HIDDEN), lambda t: (t, 0, 0)),   # per-step x
            pl.BlockSpec((B, STATE), lambda t: (0, 0)),          # resident state0
            pl.BlockSpec((STATE, GATES), lambda t: (0, 0)),      # resident weights
            pl.BlockSpec((8, GATES), lambda t: (0, 0)),          # resident aux
        ],
        out_specs=(
            pl.BlockSpec((1, B, 1), lambda t: (t, 0, 0)),        # per-step y
            pl.BlockSpec((B, STATE), lambda t: (0, 0)),          # resident state_out
        ),
        out_shape=(
            jax.ShapeDtypeStruct((T, B, 1), jnp.float32),
            jax.ShapeDtypeStruct((B, STATE), jnp.float32),
        ),
        scratch_shapes=[
            pltpu.VMEM((B, STATE), jnp.float32),    # [x | h] operand
            pltpu.VMEM((B, HIDDEN), jnp.float32),   # c
        ],
        compiler_params=pltpu.CompilerParams(
            dimension_semantics=("arbitrary",)),
    )(xs, state0, w_fused, aux)
    return ys, state_out


@jax.jit
def decoder_forward(x, state, w_fused, aux):
    """Exact PyTorch `Decoder.forward` semantics (single step).

    Args:
      x:     (B, 128, 1) float32
      state: (2, B, 128) float32 or None (None == zero init, like len(state)==0)
    Returns:
      y:     (B, 1, 1)
      state: (2, B, 128) == stack([h, c])
    """
    x2 = jnp.squeeze(x, axis=-1).astype(jnp.float32)   # (B, 128)
    B = x2.shape[0]
    if state is None:
        state0 = jnp.zeros((B, STATE), jnp.float32)
    else:
        state0 = jnp.concatenate(
            [state[0], state[1]], axis=-1).astype(jnp.float32)   # (B, 256)
    ys, state_out = decoder_rollout(x2[None], state0, w_fused, aux)
    y = ys[0].reshape(B, 1, 1)
    new_state = jnp.stack([state_out[:, :HIDDEN], state_out[:, HIDDEN:]])
    return y, new_state


def init_params(key):
    """Deterministic init matching PyTorch default U(-1/sqrt(H), 1/sqrt(H))."""
    k = 1.0 / jnp.sqrt(jnp.float32(HIDDEN))
    keys = jax.random.split(key, 6)
    w_ih = jax.random.uniform(keys[0], (4 * HIDDEN, HIDDEN), jnp.float32, -k, k)
    w_hh = jax.random.uniform(keys[1], (4 * HIDDEN, HIDDEN), jnp.float32, -k, k)
    b_ih = jax.random.uniform(keys[2], (4 * HIDDEN,), jnp.float32, -k, k)
    b_hh = jax.random.uniform(keys[3], (4 * HIDDEN,), jnp.float32, -k, k)
    conv_w = jax.random.uniform(keys[4], (1, HIDDEN, 1), jnp.float32, -k, k)
    conv_b = jax.random.uniform(keys[5], (1,), jnp.float32, -k, k)
    return w_ih, w_hh, b_ih, b_hh, conv_w, conv_b


# ----------------------------- pure-JAX reference ---------------------------

def _lstm_step_ref(x2, h, c, w_ih, w_hh, b_ih, b_hh):
    gates = x2 @ w_ih.T + h @ w_hh.T + b_ih + b_hh
    i_g = jax.nn.sigmoid(gates[:, 0 * HIDDEN:1 * HIDDEN])
    f_g = jax.nn.sigmoid(gates[:, 1 * HIDDEN:2 * HIDDEN])
    g_g = jnp.tanh(gates[:, 2 * HIDDEN:3 * HIDDEN])
    o_g = jax.nn.sigmoid(gates[:, 3 * HIDDEN:4 * HIDDEN])
    c_new = f_g * c + i_g * g_g
    h_new = o_g * jnp.tanh(c_new)
    return h_new, c_new


def _head_ref(h, conv_w, conv_b):
    a = jnp.maximum(h, 0.0)
    return jax.nn.sigmoid(a @ conv_w.reshape(1, HIDDEN).T + conv_b)   # (B, 1)


def _reference_forward(x, state, params):
    w_ih, w_hh, b_ih, b_hh, conv_w, conv_b = params
    x2 = jnp.squeeze(x, axis=-1)
    B = x2.shape[0]
    if state is None:
        h = jnp.zeros((B, HIDDEN), jnp.float32)
        c = jnp.zeros((B, HIDDEN), jnp.float32)
    else:
        h, c = state[0], state[1]
    h, c = _lstm_step_ref(x2, h, c, w_ih, w_hh, b_ih, b_hh)
    y = _head_ref(h, conv_w, conv_b)
    return y.reshape(B, 1, 1), jnp.stack([h, c])


def _reference_rollout(xs, state0, params):
    w_ih, w_hh, b_ih, b_hh, conv_w, conv_b = params
    T, B, _ = xs.shape
    h, c = state0[:, :HIDDEN], state0[:, HIDDEN:]
    ys = []
    for t in range(T):
        h, c = _lstm_step_ref(xs[t], h, c, w_ih, w_hh, b_ih, b_hh)
        ys.append(_head_ref(h, conv_w, conv_b))
    return jnp.stack(ys), jnp.concatenate([h, c], axis=-1)


if __name__ == "__main__":
    key = jax.random.PRNGKey(0)
    pkey, xkey, skey = jax.random.split(key, 3)

    raw_params = init_params(pkey)

    B, T = 2, 8
    xs = jax.random.normal(xkey, (T, B, HIDDEN), jnp.float32)
    state_in = jax.random.normal(skey, (2, B, HIDDEN), jnp.float32)
    x_step = xs[0][..., None]                                     # (B, 128, 1)
    state0_flat = jnp.concatenate([state_in[0], state_in[1]], axis=-1)

    # ---- exact-parity path (f32 weights) ----
    w32, aux32 = prepare_params(*raw_params, use_bf16=False)
    y0, st0 = decoder_forward(x_step, None, w32, aux32)            # forward(x)
    y1, st1 = decoder_forward(x_step, state_in, w32, aux32)        # forward(x, state)
    ys32, stf32 = decoder_rollout(xs, state0_flat, w32, aux32)     # T-step rollout

    # ---- default fast path (bf16 weights, f32 accumulate) ----
    wbf, auxbf = prepare_params(*raw_params, use_bf16=True)
    ysbf, stfbf = decoder_rollout(xs, state0_flat, wbf, auxbf)

    jax.block_until_ready((y0, st0, y1, st1, ys32, stf32, ysbf, stfbf))

    # Pure-JAX references.
    ry0, rst0 = _reference_forward(x_step, None, raw_params)
    ry1, rst1 = _reference_forward(x_step, state_in, raw_params)
    rys, rstf = _reference_rollout(xs, state0_flat, raw_params)

    # Shapes.
    assert y0.shape == (B, 1, 1) and st0.shape == (2, B, HIDDEN)
    assert y1.shape == (B, 1, 1) and st1.shape == (2, B, HIDDEN)
    assert ys32.shape == (T, B, 1) and stf32.shape == (B, STATE)

    # f32 path: tight parity with the reference.
    assert bool(jnp.allclose(y0, ry0, atol=2e-5, rtol=2e-5))
    assert bool(jnp.allclose(st0, rst0, atol=2e-5, rtol=2e-5))
    assert bool(jnp.allclose(y1, ry1, atol=2e-5, rtol=2e-5))
    assert bool(jnp.allclose(st1, rst1, atol=2e-5, rtol=2e-5))
    assert bool(jnp.allclose(ys32, rys, atol=1e-4, rtol=1e-4))
    assert bool(jnp.allclose(stf32, rstf, atol=1e-4, rtol=1e-4))

    # bf16-weight path: looser tolerance (weights rounded to bf16).
    assert bool(jnp.allclose(ysbf, rys, atol=3e-2))
    assert bool(jnp.allclose(stfbf, rstf, atol=3e-2))

    # Sigmoid range sanity.
    assert bool(jnp.all((y0 >= 0.0) & (y0 <= 1.0)))
    assert bool(jnp.all((ys32 >= 0.0) & (ys32 <= 1.0)))

    print("KERNEL_OK")
</pallas_src>

<mosaic_0001>
module attributes {stable_mosaic.version = 11 : i64} {
  func.func @_decoder_rollout_kernel(%arg0: i32, %arg1: memref<1x2x128xf32, #tpu.memory_space<vmem>>, %arg2: memref<2x256xf32, #tpu.memory_space<vmem>>, %arg3: memref<256x512xf32, #tpu.memory_space<vmem>>, %arg4: memref<8x512xf32, #tpu.memory_space<vmem>>, %arg5: memref<1x2x1xf32, #tpu.memory_space<vmem>>, %arg6: memref<2x256xf32, #tpu.memory_space<vmem>>, %arg7: memref<2x256xf32, #tpu.memory_space<vmem>>, %arg8: memref<2x128xf32, #tpu.memory_space<vmem>>) attributes {dimension_semantics = [#tpu.dimension_semantics<arbitrary>], iteration_bounds = array<i64: 1>, scalar_prefetch = 0 : i64, scratch_operands = 2 : i64, tpu.core_type = #tpu.core_type<tc>, window_params = [{transform_indices = @transform_0, window_bounds = array<i64: 1, 2, 128>}, {pipeline_mode = #tpu.pipeline_mode<synchronous>, transform_indices = @transform_1, window_bounds = array<i64: 2, 256>}, {pipeline_mode = #tpu.pipeline_mode<synchronous>, transform_indices = @transform_2, window_bounds = array<i64: 256, 512>}, {pipeline_mode = #tpu.pipeline_mode<synchronous>, transform_indices = @transform_3, window_bounds = array<i64: 8, 512>}, {transform_indices = @transform_4, window_bounds = array<i64: 1, 2, 1>}, {pipeline_mode = #tpu.pipeline_mode<synchronous>, transform_indices = @transform_5, window_bounds = array<i64: 2, 256>}]} {
    %c0_i32 = arith.constant 0 : i32
    %0 = arith.cmpi eq, %arg0, %c0_i32 : i32
    %1 = arith.extui %0 : i1 to i32
    %c0_i32_0 = arith.constant 0 : i32
    %2 = arith.cmpi ne, %1, %c0_i32_0 : i32
    scf.if %2 {
      %c0_29 = arith.constant 0 : index
      %c0_30 = arith.constant 0 : index
      %61 = vector.load %arg2[%c0_29, %c0_30] : memref<2x256xf32, #tpu.memory_space<vmem>>, vector<2x128xf32>
      %c0_31 = arith.constant 0 : index
      %c128_32 = arith.constant 128 : index
      %62 = vector.load %arg7[%c0_31, %c128_32] : memref<2x256xf32, #tpu.memory_space<vmem>>, vector<2x128xf32>
      tpu.vector_store %arg7[%c0_31, %c128_32], %61 {strides = array<i32>} : memref<2x256xf32, #tpu.memory_space<vmem>>, vector<2x128xf32>,
      %c0_33 = arith.constant 0 : index
      %c128_34 = arith.constant 128 : index
      %63 = vector.load %arg2[%c0_33, %c128_34] : memref<2x256xf32, #tpu.memory_space<vmem>>, vector<2x128xf32>
      %c0_35 = arith.constant 0 : index
      %c0_36 = arith.constant 0 : index
      %64 = vector.load %arg8[%c0_35, %c0_36] : memref<2x128xf32, #tpu.memory_space<vmem>>, vector<2x128xf32>
      tpu.vector_store %arg8[%c0_35, %c0_36], %63 {strides = array<i32>} : memref<2x128xf32, #tpu.memory_space<vmem>>, vector<2x128xf32>,
    } else {
    }
    %c0 = arith.constant 0 : index
    %c0_1 = arith.constant 0 : index
    %c0_2 = arith.constant 0 : index
    %3 = vector.load %arg1[%c0, %c0_1, %c0_2] : memref<1x2x128xf32, #tpu.memory_space<vmem>>, vector<1x2x128xf32>
    %4 = vector.shape_cast %3 : vector<1x2x128xf32> to vector<2x128xf32>
    %c0_3 = arith.constant 0 : index
    %c0_4 = arith.constant 0 : index
    %5 = vector.load %arg7[%c0_3, %c0_4] : memref<2x256xf32, #tpu.memory_space<vmem>>, vector<2x128xf32>
    tpu.vector_store %arg7[%c0_3, %c0_4], %4 {strides = array<i32>} : memref<2x256xf32, #tpu.memory_space<vmem>>, vector<2x128xf32>,
    %c0_5 = arith.constant 0 : index
    %c0_6 = arith.constant 0 : index
    %6 = vector.load %arg7[%c0_5, %c0_6] : memref<2x256xf32, #tpu.memory_space<vmem>>, vector<2x256xf32>
    %c0_7 = arith.constant 0 : index
    %c0_8 = arith.constant 0 : index
    %7 = vector.load %arg3[%c0_7, %c0_8] : memref<256x512xf32, #tpu.memory_space<vmem>>, vector<256x512xf32>
    %cst = arith.constant dense<0.000000e+00> : vector<2x512xf32>
    %8 = tpu.matmul %6, %7, %cst {dimension_numbers = #tpu.dot_dimension_numbers<[1], [0], [0], [1], [0, 0, 1, 1], [], []>} : vector<2x256xf32>, vector<256x512xf32>, vector<2x512xf32> -> vector<2x512xf32>
    %c0_9 = arith.constant 0 : index
    %c0_10 = arith.constant 0 : index
    %9 = vector.load %arg4[%c0_9, %c0_10] : memref<8x512xf32, #tpu.memory_space<vmem>>, vector<1x512xf32>
    %10 = vector.broadcast %9 : vector<1x512xf32> to vector<2x512xf32>
    %11 = arith.addf %8, %10 : vector<2x512xf32>
    %12 = vector.extract_strided_slice %11 {offsets = [0, 0], sizes = [2, 128], strides = [1, 1]} : vector<2x512xf32> to vector<2x128xf32>
    %13 = arith.negf %12 : vector<2x128xf32>
    %14 = math.exp %13 : vector<2x128xf32>
    %cst_11 = arith.constant 1.000000e+00 : f32
    %15 = vector.broadcast %cst_11 : f32 to vector<2x128xf32>
    %16 = arith.addf %15, %14 : vector<2x128xf32>
    %17 = arith.divf %15, %16 : vector<2x128xf32>
    %18 = vector.extract_strided_slice %11 {offsets = [0, 128], sizes = [2, 128], strides = [1, 1]} : vector<2x512xf32> to vector<2x128xf32>
    %19 = arith.negf %18 : vector<2x128xf32>
    %20 = math.exp %19 : vector<2x128xf32>
    %cst_12 = arith.constant 1.000000e+00 : f32
    %21 = vector.broadcast %cst_12 : f32 to vector<2x128xf32>
    %22 = arith.addf %21, %20 : vector<2x128xf32>
    %23 = arith.divf %21, %22 : vector<2x128xf32>
    %24 = vector.extract_strided_slice %11 {offsets = [0, 256], sizes = [2, 128], strides = [1, 1]} : vector<2x512xf32> to vector<2x128xf32>
    %25 = math.tanh %24 : vector<2x128xf32>
    %26 = vector.extract_strided_slice %11 {offsets = [0, 384], sizes = [2, 128], strides = [1, 1]} : vector<2x512xf32> to vector<2x128xf32>
    %27 = arith.negf %26 : vector<2x128xf32>
    %28 = math.exp %27 : vector<2x128xf32>
    %cst_13 = arith.constant 1.000000e+00 : f32
    %29 = vector.broadcast %cst_13 : f32 to vector<2x128xf32>
    %30 = arith.addf %29, %28 : vector<2x128xf32>
    %31 = arith.divf %29, %30 : vector<2x128xf32>
    %c0_14 = arith.constant 0 : index
    %c0_15 = arith.constant 0 : index
    %32 = vector.load %arg8[%c0_14, %c0_15] : memref<2x128xf32, #tpu.memory_space<vmem>>, vector<2x128xf32>
    %33 = arith.mulf %23, %32 : vector<2x128xf32>
    %34 = arith.mulf %17, %25 : vector<2x128xf32>
    %35 = arith.addf %33, %34 : vector<2x128xf32>
    %36 = math.tanh %35 : vector<2x128xf32>
    %37 = arith.mulf %31, %36 : vector<2x128xf32>
    %c0_16 = arith.constant 0 : index
    %c0_17 = arith.constant 0 : index
    %38 = vector.load %arg8[%c0_16, %c0_17] : memref<2x128xf32, #tpu.memory_space<vmem>>, vector<2x128xf32>
    tpu.vector_store %arg8[%c0_16, %c0_17], %35 {strides = array<i32>} : memref<2x128xf32, #tpu.memory_space<vmem>>, vector<2x128xf32>,
    %c0_18 = arith.constant 0 : index
    %c128 = arith.constant 128 : index
    %39 = vector.load %arg7[%c0_18, %c128] : memref<2x256xf32, #tpu.memory_space<vmem>>, vector<2x128xf32>
    tpu.vector_store %arg7[%c0_18, %c128], %37 {strides = array<i32>} : memref<2x256xf32, #tpu.memory_space<vmem>>, vector<2x128xf32>,
    %cst_19 = arith.constant 0.000000e+00 : f32
    %40 = vector.broadcast %cst_19 : f32 to vector<2x128xf32>
    %41 = arith.maximumf %37, %40 : vector<2x128xf32>
    %c1 = arith.constant 1 : index
    %c0_20 = arith.constant 0 : index
    %42 = vector.load %arg4[%c1, %c0_20] : memref<8x512xf32, #tpu.memory_space<vmem>>, vector<1x128xf32>
    %43 = vector.broadcast %42 : vector<1x128xf32> to vector<2x128xf32>
    %44 = arith.mulf %41, %43 : vector<2x128xf32>
    %cst_21 = arith.constant dense<0.000000e+00> : vector<2xf32>
    %45 = vector.multi_reduction <add>, %44, %cst_21 [1] : vector<2x128xf32> to vector<2xf32>
    %46 = vector.shape_cast %45 : vector<2xf32> to vector<2x1xf32>
    %c2 = arith.constant 2 : index
    %c0_22 = arith.constant 0 : index
    %47 = vector.load %arg4[%c2, %c0_22] : memref<8x512xf32, #tpu.memory_space<vmem>>, vector<1x1xf32>
    %48 = vector.broadcast %47 : vector<1x1xf32> to vector<2x1xf32>
    %49 = arith.addf %46, %48 : vector<2x1xf32>
    %50 = arith.negf %49 : vector<2x1xf32>
    %51 = math.exp %50 : vector<2x1xf32>
    %cst_23 = arith.constant 1.000000e+00 : f32
    %52 = vector.broadcast %cst_23 : f32 to vector<2x1xf32>
    %53 = arith.addf %52, %51 : vector<2x1xf32>
    %54 = arith.divf %52, %53 : vector<2x1xf32>
    %c0_24 = arith.constant 0 : index
    %c0_25 = arith.constant 0 : index
    %c0_26 = arith.constant 0 : index
    %55 = vector.load %arg5[%c0_24, %c0_25, %c0_26] : memref<1x2x1xf32, #tpu.memory_space<vmem>>, vector<1x2x1xf32>
    %56 = vector.shape_cast %55 : vector<1x2x1xf32> to vector<2x1xf32>
    %57 = vector.shape_cast %54 : vector<2x1xf32> to vector<1x2x1xf32>
    tpu.vector_store %arg5[%c0_24, %c0_25, %c0_26], %57 {strides = array<i32>} : memref<1x2x1xf32, #tpu.memory_space<vmem>>, vector<1x2x1xf32>,
    %c0_i32_27 = arith.constant 0 : i32
    %58 = arith.cmpi eq, %arg0, %c0_i32_27 : i32
    %59 = arith.extui %58 : i1 to i32
    %c0_i32_28 = arith.constant 0 : i32
    %60 = arith.cmpi ne, %59, %c0_i32_28 : i32
    scf.if %60 {
      %c0_29 = arith.constant 0 : index
      %c0_30 = arith.constant 0 : index
      %61 = vector.load %arg6[%c0_29, %c0_30] : memref<2x256xf32, #tpu.memory_space<vmem>>, vector<2x128xf32>
      tpu.vector_store %arg6[%c0_29, %c0_30], %37 {strides = array<i32>} : memref<2x256xf32, #tpu.memory_space<vmem>>, vector<2x128xf32>,
      %c0_31 = arith.constant 0 : index
      %c128_32 = arith.constant 128 : index
      %62 = vector.load %arg6[%c0_31, %c128_32] : memref<2x256xf32, #tpu.memory_space<vmem>>, vector<2x128xf32>
      tpu.vector_store %arg6[%c0_31, %c128_32], %35 {strides = array<i32>} : memref<2x256xf32, #tpu.memory_space<vmem>>, vector<2x128xf32>,
    } else {
    }
    return
  }
  func.func @transform_0(%arg0: i32) -> (i32, i32, i32) {
    %c0_i32 = arith.constant 0 : i32
    %c0_i32_0 = arith.constant 0 : i32
    %c0_i32_1 = arith.constant 0 : i32
    return %arg0, %c0_i32, %c0_i32_0 : i32, i32, i32
  }
  func.func @transform_1(%arg0: i32) -> (i32, i32) {
    %c0_i32 = arith.constant 0 : i32
    %c0_i32_0 = arith.constant 0 : i32
    %c0_i32_1 = arith.constant 0 : i32
    return %c0_i32, %c0_i32_0 : i32, i32
  }
  func.func @transform_2(%arg0: i32) -> (i32, i32) {
    %c0_i32 = arith.constant 0 : i32
    %c0_i32_0 = arith.constant 0 : i32
    %c0_i32_1 = arith.constant 0 : i32
    return %c0_i32, %c0_i32_0 : i32, i32
  }
  func.func @transform_3(%arg0: i32) -> (i32, i32) {
    %c0_i32 = arith.constant 0 : i32
    %c0_i32_0 = arith.constant 0 : i32
    %c0_i32_1 = arith.constant 0 : i32
    return %c0_i32, %c0_i32_0 : i32, i32
  }
  func.func @transform_4(%arg0: i32) -> (i32, i32, i32) {
    %c0_i32 = arith.constant 0 : i32
    %c0_i32_0 = arith.constant 0 : i32
    %c0_i32_1 = arith.constant 0 : i32
    return %arg0, %c0_i32, %c0_i32_0 : i32, i32, i32
  }
  func.func @transform_5(%arg0: i32) -> (i32, i32) {
    %c0_i32 = arith.constant 0 : i32
    %c0_i32_0 = arith.constant 0 : i32
    %c0_i32_1 = arith.constant 0 : i32
    return %c0_i32, %c0_i32_0 : i32, i32
  }
}

</mosaic_0001>

<bundles_post_ra>
// kernel: decoder_rollout.1
= control target key start
LH: loop header
LB: loop body
LE: loop exit
PB: predicated region body
PF: predicated region fallthrough
CT: control target
= control target key end

     0   :  { %11 = vsyncpa [#allocation5], 0  ;;  %s837_s0 = inlined_call_operand.hbm [shape: f32[1,2,128], index: 0, kind: input, shape index: {}]   ;;  %s838_s1 = inlined_call_operand.hbm [shape: f32[2,256], index: 1, kind: input, shape index: {}]   ;;  %s839_s2 = inlined_call_operand.hbm [shape: f32[256,512], index: 2, kind: input, shape index: {}]   ;;  %s840_s3 = inlined_call_operand.hbm [shape: f32[8,512], index: 3, kind: input, shape index: {}]   ;;  %s841_s4 = inlined_call_operand.vmem [shape: f32[1,2,1], index: 4, kind: output, shape index: {0}]   ;;  %s842_s5 = inlined_call_operand.hbm [shape: f32[2,256], index: 5, kind: output, shape index: {1}]  }
   0x1   :  { %12 = vsyncpa [#allocation8], 0 }
   0x2   :  { %13 = vsyncpa [#allocation11], 0 }
   0x3   :  { %14 = vsyncpa [#allocation6], 0  ;;  %s731_s18 = smov [#allocation7]   ;;  %s732_s20 = smov [#allocation4]  }
   0x4   :  { %s31_s19 = sshll.u32 %s731_s18, 4  ;;  %s21_s21 = sshll.u32 %s732_s20, 4  ;;  %s32_s19 = int_to_ptr.vmem [resolvable:$true] %s31_s19  ;;  %s22_s21 = int_to_ptr.vmem [resolvable:$true] %s21_s21 }
   0x5   :  { %s613_s24 = scalar_lea.hbm %s838_s1, 64 }
   0x6   :  { %p614_p0 = scmp.ne.s32.totalorder %s838_s1, %s613_s24  ;;  %p617_p1 = scmp.lt.u32.totalorder %s613_s24, %s838_s1 }
   0x8   :  { %p619_p2 = pnand %p617_p1, %p614_p0 }
   0xa   :  { %622 = shalt.err (!%p619_p2)
}
   0xb   :  { %s623_s29 = scalar_lea.vmem %s32_s19, 64  ;;  %p628_p4 = scmp.lt.s32.totalorder %s32_s19, %s32_s19 }
   0xc   :  { %p624_p3 = scmp.ne.s32.totalorder %s32_s19, %s623_s29  ;;  %p629_p5 = scmp.lt.s32.totalorder %s623_s29, %s623_s29 }
   0xe   :  { %p630_p6 = por %p629_p5, %p628_p4 }
  0x10   :  { %p631_p7 = pnand %p630_p6, %p624_p3 }
  0x12   :  { %634 = shalt.err (!%p631_p7)
}
  0x13   :  { %34 = dma.hbm_to_vmem [thread:$0]  %s838_s1, 64, %s32_s19, [#allocation8]  }
  0x14   :  { %s635_s9 = scalar_lea.hbm %s837_s0, 32 }
  0x15   :  { %p636_p8 = scmp.ne.s32.totalorder %s837_s0, %s635_s9  ;;  %p639_p9 = scmp.lt.u32.totalorder %s635_s9, %s837_s0 }
  0x17   :  { %p641_p10 = pnand %p639_p9, %p636_p8 }
  0x19   :  { %644 = shalt.err (!%p641_p10)
}
  0x1a   :  { %s645_s14 = scalar_lea.vmem %s22_s21, 32  ;;  %p650_p12 = scmp.lt.s32.totalorder %s22_s21, %s22_s21 }
  0x1b   :  { %p646_p11 = scmp.ne.s32.totalorder %s22_s21, %s645_s14  ;;  %p651_p13 = scmp.lt.s32.totalorder %s645_s14, %s645_s14 }
  0x1d   :  { %p652_p0 = por %p651_p13, %p650_p12 }
  0x1f   :  { %p653_p1 = pnand %p652_p0, %p646_p11 }
  0x21   :  { %656 = shalt.err (!%p653_p1)
}
  0x22   :  { %24 = dma.hbm_to_vmem [thread:$0]  %s837_s0, 32, %s22_s21, [#allocation5]  }
  0x23   :  { %s733_s16 = smov [#allocation9]   ;;  %s657_s20 = scalar_lea.hbm %s839_s2, 16384 }
  0x24   :  { %s40_s17 = sshll.u32 %s733_s16, 4  ;;  %p658_p2 = scmp.ne.s32.totalorder %s839_s2, %s657_s20  ;;  %s41_s17 = int_to_ptr.vmem [resolvable:$true] %s40_s17 }
  0x25   :  { %p661_p3 = scmp.lt.u32.totalorder %s657_s20, %s839_s2 }
  0x27   :  { %p663_p4 = pnand %p661_p3, %p658_p2 }
  0x29   :  { %666 = shalt.err (!%p663_p4)
}
  0x2a   :  { %s667_s26 = scalar_lea.vmem %s41_s17, 16384  ;;  %p672_p6 = scmp.lt.s32.totalorder %s41_s17, %s41_s17 }
  0x2b   :  { %p668_p5 = scmp.ne.s32.totalorder %s41_s17, %s667_s26  ;;  %p673_p7 = scmp.lt.s32.totalorder %s667_s26, %s667_s26 }
  0x2d   :  { %p674_p8 = por %p673_p7, %p672_p6 }
  0x2f   :  { %p675_p9 = pnand %p674_p8, %p668_p5 }
  0x31   :  { %678 = shalt.err (!%p675_p9)
}
  0x32   :  { %s734_s0 = smov 512   ;;  %s735_s21 = smov 32  }
  0x33   :  { %46 = dma.hbm_to_vmem [thread:$0]  %s839_s2, 16384, %s41_s17, [#allocation8], %s734_s0, %s734_s0, %s735_s21  }
  0x34   :  { %s736_s29 = smov [#allocation10]   ;;  %s679_s8 = scalar_lea.hbm %s840_s3, 512 }
  0x35   :  { %s53_s30 = sshll.u32 %s736_s29, 4  ;;  %p680_p10 = scmp.ne.s32.totalorder %s840_s3, %s679_s8  ;;  %s54_s30 = int_to_ptr.vmem [resolvable:$true] %s53_s30 }
  0x36   :  { %p683_p11 = scmp.lt.u32.totalorder %s679_s8, %s840_s3 }
  0x38   :  { %p685_p12 = pnand %p683_p11, %p680_p10 }
  0x3a   :  { %688 = shalt.err (!%p685_p12)
}
  0x3b   :  { %s689_s13 = scalar_lea.vmem %s54_s30, 512  ;;  %p694_p0 = scmp.lt.s32.totalorder %s54_s30, %s54_s30 }
  0x3c   :  { %p690_p13 = scmp.ne.s32.totalorder %s54_s30, %s689_s13  ;;  %p695_p1 = scmp.lt.s32.totalorder %s689_s13, %s689_s13 }
  0x3e   :  { %p696_p2 = por %p695_p1, %p694_p0 }
  0x40   :  { %p697_p3 = pnand %p696_p2, %p690_p13 }
  0x42   :  { %700 = shalt.err (!%p697_p3)
}
  0x43   :  { %56 = dma.hbm_to_vmem [thread:$0]  %s840_s3, 512, %s54_s30, [#allocation11]  }
  0x44   :  { %723 = dma.done.wait [#allocation5], 32  }
  0x45   :  { %724 = vsyncadd [#allocation5], 4294967264 }
  0x46   :  { %725 = dma.done.wait [#allocation8], 16448  }
  0x47   :  { %726 = vsyncadd [#allocation8], 4294950848 }
  0x48   :  { %727 = dma.done.wait [#allocation11], 512  }
  0x49   :  { %728 = vsyncadd [#allocation11], 4294966784  ;;  %v81_v0 = vld [vmem:[#allocation9 + $0x8] sm:$0xff]  ;;  %v80_v2 = vld [vmem:[#allocation9] sm:$0xff]  ;;  %vm413_vm0 = vcmask 1041408   ;;  %s737_s3 = smov [#allocation12]  }
  0x4a   :  { %v85_v1 = vld [vmem:[#allocation9 + $0x28] sm:$0xff]  ;;  %v84_v4 = vld [vmem:[#allocation9 + $0x20] sm:$0xff]  ;;  %v83_v18 = vld [vmem:[#allocation9 + $0x18] sm:$0xff]  ;;  %s440_s1 = sshll.u32 %s737_s3, 4  ;;  %s441_s1 = int_to_ptr.vmem [resolvable:$true] %s440_s1 }
  0x4b   :  { %v458_v3 = vpack.c.bf16 %v85_v1, %v81_v0  ;;  %v89_v5 = vld [vmem:[#allocation9 + $0x48] sm:$0xff]  ;;  %v460_v7 = vpack.c.bf16 %v84_v4, %v80_v2  ;;  %v88_v9 = vld [vmem:[#allocation9 + $0x40] sm:$0xff]  ;;  %v87_v19 = vld [vmem:[#allocation9 + $0x38] sm:$0xff]  ;;  %s701_s15 = scalar_lea.vmem %s441_s1, 64  ;;  %p706_p5 = scmp.lt.s32.totalorder %s441_s1, %s441_s1 }
  0x4c   :  { %v93_v6 = vld [vmem:[#allocation9 + $0x68] sm:$0xff]  ;;  %v92_v10 = vld [vmem:[#allocation9 + $0x60] sm:$0xff]  ;;  %v522_v21 = vpack.c.bf16 %v87_v19, %v83_v18  ;;  %v82_v22 = vld [vmem:[#allocation9 + $0x10] sm:$0xff]  ;;  %p702_p4 = scmp.ne.s32.totalorder %s441_s1, %s701_s15  ;;  %p707_p6 = scmp.lt.s32.totalorder %s701_s15, %s701_s15 }
  0x4d   :  { %v462_v8 = vpack.c.bf16 %v93_v6, %v89_v5  ;;  %v97_v11 = vld [vmem:[#allocation9 + $0x88] sm:$0xff]  ;;  %459 = vmatprep.subr.bf16.mxu0 %v458_v3  ;;  %v464_v13 = vpack.c.bf16 %v92_v10, %v88_v9  ;;  %v96_v14 = vld [vmem:[#allocation9 + $0x80] sm:$0xff]  ;;  %v86_v23 = vld [vmem:[#allocation9 + $0x30] sm:$0xff] }
  0x4e   :  { %v101_v12 = vld [vmem:[#allocation9 + $0xa8] sm:$0xff]  ;;  %461 = vmatpush1.bf16.msra.mxu0 %v460_v7  ;;  %v100_v15 = vld [vmem:[#allocation9 + $0xa0] sm:$0xff]  ;;  %v524_v24 = vpack.c.bf16 %v86_v23, %v82_v22  ;;  %523 = vmatprep.subr.bf16.mxu1 %v522_v21  ;;  %v91_v26 = vld [vmem:[#allocation9 + $0x58] sm:$0xff]  ;;  %p708_p7 = por %p707_p6, %p706_p5 }
  0x4f   :  { %463 = vmatprep.subr.bf16.mxu0 %v462_v8  ;;  %v466_v16 = vpack.c.bf16 %v101_v12, %v97_v11  ;;  %v105_v17 = vld [vmem:[#allocation9 + $0xc8] sm:$0xff]  ;;  %v468_v25 = vpack.c.bf16 %v100_v15, %v96_v14  ;;  %v95_v27 = vld [vmem:[#allocation9 + $0x78] sm:$0xff]  ;;  %v90_v28 = vld [vmem:[#allocation9 + $0x50] sm:$0xff] }
  0x50   :  { %v109_v20 = vld [vmem:[#allocation9 + $0xe8] sm:$0xff]  ;;  %v104_v30 = vld [vmem:[#allocation9 + $0xc0] sm:$0xff]  ;;  %525 = vmatpush1.bf16.msra.mxu1 %v524_v24  ;;  %v526_v32 = vpack.c.bf16 %v95_v27, %v91_v26  ;;  %v94_v33 = vld [vmem:[#allocation9 + $0x70] sm:$0xff]  ;;  %p709_p8 = pnand %p708_p7, %p702_p4 }
  0x51   :  { %v470_v29 = vpack.c.bf16 %v109_v20, %v105_v17  ;;  %v108_v31 = vld [vmem:[#allocation9 + $0xe0] sm:$0xff]  ;;  %v113_v34 = vld [vmem:[#allocation9 + $0x108] sm:$0xff]  ;;  %v528_v36 = vpack.c.bf16 %v94_v33, %v90_v28  ;;  %v99_v37 = vld [vmem:[#allocation9 + $0x98] sm:$0xff] }
  0x52   :  { %465 = vmatpush1.bf16.msra.mxu0 %v464_v13  ;;  %v117_v35 = vld [vmem:[#allocation9 + $0x128] sm:$0xff]  ;;  %527 = vmatprep.subr.bf16.mxu1 %v526_v32  ;;  %v103_v38 = vld [vmem:[#allocation9 + $0xb8] sm:$0xff]  ;;  %v98_v39 = vld [vmem:[#allocation9 + $0x90] sm:$0xff]  ;;  %v472_v41 = vpack.c.bf16 %v108_v31, %v104_v30 }
  0x53   :  { %467 = vmatprep.subr.bf16.mxu0 %v466_v16  ;;  %v102_v40 = vld [vmem:[#allocation9 + $0xb0] sm:$0xff]  ;;  %v112_v42 = vld [vmem:[#allocation9 + $0x100] sm:$0xff]  ;;  %v530_v44 = vpack.c.bf16 %v103_v38, %v99_v37  ;;  %v474_v45 = vpack.c.bf16 %v117_v35, %v113_v34  ;;  %v121_v46 = vld [vmem:[#allocation9 + $0x148] sm:$0xff] }
  0x54   :  { %v116_v43 = vld [vmem:[#allocation9 + $0x120] sm:$0xff]  ;;  %529 = vmatpush1.bf16.msra.mxu1 %v528_v36  ;;  %v532_v47 = vpack.c.bf16 %v102_v40, %v98_v39  ;;  %v107_v48 = vld [vmem:[#allocation9 + $0xd8] sm:$0xff]  ;;  %v125_v50 = vld [vmem:[#allocation9 + $0x168] sm:$0xff] }
  0x55   :  { %v111_v49 = vld [vmem:[#allocation9 + $0xf8] sm:$0xff]  ;;  %531 = vmatprep.subr.bf16.mxu1 %v530_v44  ;;  %v106_v52 = vld [vmem:[#allocation9 + $0xd0] sm:$0xff]  ;;  %v476_v54 = vpack.c.bf16 %v116_v43, %v112_v42  ;;  %v478_v57 = vpack.c.bf16 %v125_v50, %v121_v46  ;;  %v120_v58 = vld [vmem:[#allocation9 + $0x140] sm:$0xff] }
  0x56   :  { %469 = vmatpush1.bf16.msra.mxu0 %v468_v25  ;;  %v534_v51 = vpack.c.bf16 %v111_v49, %v107_v48  ;;  %v110_v53 = vld [vmem:[#allocation9 + $0xf0] sm:$0xff]  ;;  %v115_v55 = vld [vmem:[#allocation9 + $0x118] sm:$0xff]  ;;  %v124_v59 = vld [vmem:[#allocation9 + $0x160] sm:$0xff] }
  0x57   :  { %471 = vmatprep.subr.bf16.mxu0 %v470_v29  ;;  %v119_v56 = vld [vmem:[#allocation9 + $0x138] sm:$0xff]  ;;  %v129_v60 = vld [vmem:[#allocation9 + $0x188] sm:$0xff]  ;;  %v536_v61 = vpack.c.bf16 %v110_v53, %v106_v52  ;;  %v114_v0 = vld [vmem:[#allocation9 + $0x110] sm:$0xff]  ;;  %v480_v4 = vpack.c.bf16 %v124_v59, %v120_v58 }
  0x58   :  { %533 = vmatpush1.bf16.msra.mxu1 %v532_v47  ;;  %v133_v62 = vld [vmem:[#allocation9 + $0x1a8] sm:$0xff]  ;;  %v538_v63 = vpack.c.bf16 %v119_v56, %v115_v55  ;;  %v118_v1 = vld [vmem:[#allocation9 + $0x130] sm:$0xff]  ;;  %v123_v2 = vld [vmem:[#allocation9 + $0x158] sm:$0xff] }
  0x59   :  { %535 = vmatprep.subr.bf16.mxu1 %v534_v51  ;;  %v127_v3 = vld [vmem:[#allocation9 + $0x178] sm:$0xff]  ;;  %v482_v5 = vpack.c.bf16 %v133_v62, %v129_v60  ;;  %v128_v6 = vld [vmem:[#allocation9 + $0x180] sm:$0xff]  ;;  %v137_v8 = vld [vmem:[#allocation9 + $0x1c8] sm:$0xff]  ;;  %v540_v9 = vpack.c.bf16 %v118_v1, %v114_v0 }
  0x5a   :  { %473 = vmatpush1.bf16.msra.mxu0 %v472_v41  ;;  %v132_v7 = vld [vmem:[#allocation9 + $0x1a0] sm:$0xff]  ;;  %v141_v10 = vld [vmem:[#allocation9 + $0x1e8] sm:$0xff]  ;;  %v542_v11 = vpack.c.bf16 %v127_v3, %v123_v2  ;;  %v122_v12 = vld [vmem:[#allocation9 + $0x150] sm:$0xff] }
  0x5b   :  { %475 = vmatprep.subr.bf16.mxu0 %v474_v45  ;;  %v126_v13 = vld [vmem:[#allocation9 + $0x170] sm:$0xff]  ;;  %v131_v14 = vld [vmem:[#allocation9 + $0x198] sm:$0xff]  ;;  %v484_v16 = vpack.c.bf16 %v132_v7, %v128_v6  ;;  %v486_v17 = vpack.c.bf16 %v141_v10, %v137_v8  ;;  %v136_v18 = vld [vmem:[#allocation9 + $0x1c0] sm:$0xff] }
  0x5c   :  { %537 = vmatpush1.bf16.msra.mxu1 %v536_v61  ;;  %v135_v15 = vld [vmem:[#allocation9 + $0x1b8] sm:$0xff]  ;;  %v140_v19 = vld [vmem:[#allocation9 + $0x1e0] sm:$0xff]  ;;  %v145_v20 = vld [vmem:[#allocation9 + $0x208] sm:$0xff]  ;;  %v544_v21 = vpack.c.bf16 %v126_v13, %v122_v12 }
  0x5d   :  { %539 = vmatprep.subr.bf16.mxu1 %v538_v63  ;;  %v149_v22 = vld [vmem:[#allocation9 + $0x228] sm:$0xff]  ;;  %v546_v23 = vpack.c.bf16 %v135_v15, %v131_v14  ;;  %v130_v24 = vld [vmem:[#allocation9 + $0x190] sm:$0xff]  ;;  %v139_v26 = vld [vmem:[#allocation9 + $0x1d8] sm:$0xff]  ;;  %v488_v28 = vpack.c.bf16 %v140_v19, %v136_v18 }
  0x5e   :  { %477 = vmatpush1.bf16.msra.mxu0 %v476_v54  ;;  %v134_v25 = vld [vmem:[#allocation9 + $0x1b0] sm:$0xff]  ;;  %v143_v27 = vld [vmem:[#allocation9 + $0x1f8] sm:$0xff]  ;;  %v490_v29 = vpack.c.bf16 %v149_v22, %v145_v20  ;;  %v144_v30 = vld [vmem:[#allocation9 + $0x200] sm:$0xff] }
  0x5f   :  { %479 = vmatprep.subr.bf16.mxu0 %v478_v57  ;;  %v148_v31 = vld [vmem:[#allocation9 + $0x220] sm:$0xff]  ;;  %v153_v32 = vld [vmem:[#allocation9 + $0x248] sm:$0xff]  ;;  %v548_v33 = vpack.c.bf16 %v134_v25, %v130_v24  ;;  %v550_v35 = vpack.c.bf16 %v143_v27, %v139_v26  ;;  %v138_v36 = vld [vmem:[#allocation9 + $0x1d0] sm:$0xff] }
  0x60   :  { %541 = vmatpush1.bf16.msra.mxu1 %v540_v9  ;;  %v157_v34 = vld [vmem:[#allocation9 + $0x268] sm:$0xff]  ;;  %v142_v37 = vld [vmem:[#allocation9 + $0x1f0] sm:$0xff]  ;;  %v147_v38 = vld [vmem:[#allocation9 + $0x218] sm:$0xff]  ;;  %v492_v40 = vpack.c.bf16 %v148_v31, %v144_v30 }
  0x61   :  { %543 = vmatprep.subr.bf16.mxu1 %v542_v11  ;;  %v151_v39 = vld [vmem:[#allocation9 + $0x238] sm:$0xff]  ;;  %v494_v41 = vpack.c.bf16 %v157_v34, %v153_v32  ;;  %v152_v42 = vld [vmem:[#allocation9 + $0x240] sm:$0xff]  ;;  %v161_v44 = vld [vmem:[#allocation9 + $0x288] sm:$0xff]  ;;  %v552_v45 = vpack.c.bf16 %v142_v37, %v138_v36 }
  0x62   :  { %481 = vmatpush1.bf16.msra.mxu0 %v480_v4  ;;  %v156_v43 = vld [vmem:[#allocation9 + $0x260] sm:$0xff]  ;;  %v165_v46 = vld [vmem:[#allocation9 + $0x2a8] sm:$0xff]  ;;  %v554_v47 = vpack.c.bf16 %v151_v39, %v147_v38  ;;  %v146_v48 = vld [vmem:[#allocation9 + $0x210] sm:$0xff] }
  0x63   :  { %483 = vmatprep.subr.bf16.mxu0 %v482_v5  ;;  %v150_v49 = vld [vmem:[#allocation9 + $0x230] sm:$0xff]  ;;  %v155_v50 = vld [vmem:[#allocation9 + $0x258] sm:$0xff]  ;;  %v496_v52 = vpack.c.bf16 %v156_v43, %v152_v42  ;;  %v160_v53 = vld [vmem:[#allocation9 + $0x280] sm:$0xff]  ;;  %v498_v55 = vpack.c.bf16 %v165_v46, %v161_v44 }
  0x64   :  { %545 = vmatpush1.bf16.msra.mxu1 %v544_v21  ;;  %v159_v51 = vld [vmem:[#allocation9 + $0x278] sm:$0xff]  ;;  %v164_v54 = vld [vmem:[#allocation9 + $0x2a0] sm:$0xff]  ;;  %v169_v56 = vld [vmem:[#allocation9 + $0x2c8] sm:$0xff]  ;;  %v556_v58 = vpack.c.bf16 %v150_v49, %v146_v48 }
  0x65   :  { %547 = vmatprep.subr.bf16.mxu1 %v546_v23  ;;  %v173_v57 = vld [vmem:[#allocation9 + $0x2e8] sm:$0xff]  ;;  %v154_v59 = vld [vmem:[#allocation9 + $0x250] sm:$0xff]  ;;  %v558_v60 = vpack.c.bf16 %v159_v51, %v155_v50  ;;  %v73_v62 = vld [vmem:[#allocation7] sm:$0x3]  ;;  %v500_v2 = vpack.c.bf16 %v164_v54, %v160_v53 }
  0x66   :  { %485 = vmatpush1.bf16.msra.mxu0 %v484_v16  ;;  %v158_v61 = vld [vmem:[#allocation9 + $0x270] sm:$0xff]  ;;  %v77_v63 = vld [vmem:[#allocation4] sm:$0x3]  ;;  %74 = vst [vmem:[#allocation2 + $0x2] sm:$0x3] %v73_v62  ;;  %v502_v3 = vpack.c.bf16 %v173_v57, %v169_v56  ;;  %v168_v4 = vld [vmem:[#allocation9 + $0x2c0] sm:$0xff] }
  0x67   :  { %487 = vmatprep.subr.bf16.mxu0 %v486_v17  ;;  %v163_v0 = vld [vmem:[#allocation9 + $0x298] sm:$0xff]  ;;  %78 = vst [vmem:[#allocation2] sm:$0x3] %v77_v63  ;;  %v172_v5 = vld [vmem:[#allocation9 + $0x2e0] sm:$0xff]  ;;  %v177_v6 = vld [vmem:[#allocation9 + $0x308] sm:$0xff]  ;;  %v560_v7 = vpack.c.bf16 %v158_v61, %v154_v59 }
  0x68   :  { %549 = vmatpush1.bf16.msra.mxu1 %v548_v33  ;;  %v167_v1 = vld [vmem:[#allocation9 + $0x2b8] sm:$0xff]  ;;  %v181_v8 = vld [vmem:[#allocation9 + $0x328] sm:$0xff]  ;;  %v162_v10 = vld [vmem:[#allocation9 + $0x290] sm:$0xff]  ;;  %v504_v14 = vpack.c.bf16 %v172_v5, %v168_v4  ;;  %v210_v5 = vlaneseq }
  0x69   :  { %551 = vmatprep.subr.bf16.mxu1 %v550_v35  ;;  %v562_v9 = vpack.c.bf16 %v167_v1, %v163_v0  ;;  %v166_v11 = vld [vmem:[#allocation9 + $0x2b0] sm:$0xff]  ;;  %v171_v12 = vld [vmem:[#allocation9 + $0x2d8] sm:$0xff]  ;;  %v176_v15 = vld [vmem:[#allocation9 + $0x300] sm:$0xff]  ;;  %v506_v16 = vpack.c.bf16 %v181_v8, %v177_v6 }
  0x6a   :  { %489 = vmatpush1.bf16.msra.mxu0 %v488_v28  ;;  %v175_v13 = vld [vmem:[#allocation9 + $0x2f8] sm:$0xff]  ;;  %v180_v17 = vld [vmem:[#allocation9 + $0x320] sm:$0xff]  ;;  %v185_v18 = vld [vmem:[#allocation9 + $0x348] sm:$0xff]  ;;  %v564_v20 = vpack.c.bf16 %v166_v11, %v162_v10  ;;  %v211_v6 = vshrl.u32 %v210_v5, 7 }
  0x6b   :  { %491 = vmatprep.subr.bf16.mxu0 %v490_v29  ;;  %v189_v19 = vld [vmem:[#allocation9 + $0x368] sm:$0xff]  ;;  %v566_v21 = vpack.c.bf16 %v175_v13, %v171_v12  ;;  %v170_v22 = vld [vmem:[#allocation9 + $0x2d0] sm:$0xff]  ;;  %v179_v25 = vld [vmem:[#allocation9 + $0x318] sm:$0xff]  ;;  %v508_v28 = vpack.c.bf16 %v180_v17, %v176_v15 }
  0x6c   :  { %553 = vmatpush1.bf16.msra.mxu1 %v552_v45  ;;  %v174_v23 = vld [vmem:[#allocation9 + $0x2f0] sm:$0xff]  ;;  %v183_v26 = vld [vmem:[#allocation9 + $0x338] sm:$0xff]  ;;  %v510_v29 = vpack.c.bf16 %v189_v19, %v185_v18  ;;  %v184_v30 = vld [vmem:[#allocation9 + $0x340] sm:$0xff]  ;;  %v224_v12 = vsub.s32 3, %v211_v6 }
  0x6d   :  { %555 = vmatprep.subr.bf16.mxu1 %v554_v47  ;;  %v188_v31 = vld [vmem:[#allocation9 + $0x360] sm:$0xff]  ;;  %v193_v32 = vld [vmem:[#allocation9 + $0x388] sm:$0xff]  ;;  %v568_v33 = vpack.c.bf16 %v174_v23, %v170_v22  ;;  %v570_v35 = vpack.c.bf16 %v183_v26, %v179_v25  ;;  %v178_v36 = vld [vmem:[#allocation9 + $0x310] sm:$0xff] }
  0x6e   :  { %493 = vmatpush1.bf16.msra.mxu0 %v492_v40  ;;  %v816_v24 = vld.sshfl [vmem:[#allocation2] sm:$0x33 pattern:$0x76325410]  ;;  %v197_v34 = vld [vmem:[#allocation9 + $0x3a8] sm:$0xff]  ;;  %v187_v38 = vld [vmem:[#allocation9 + $0x358] sm:$0xff]  ;;  %v512_v40 = vpack.c.bf16 %v188_v31, %v184_v30 }
  0x6f   :  { %495 = vmatprep.subr.bf16.mxu0 %v494_v41  ;;  %v238_v27 = vcombine.high %v816_v24, %v816_v24  ;;  %v182_v37 = vld [vmem:[#allocation9 + $0x330] sm:$0xff]  ;;  %v191_v39 = vld [vmem:[#allocation9 + $0x378] sm:$0xff]  ;;  %v514_v41 = vpack.c.bf16 %v197_v34, %v193_v32  ;;  %v192_v42 = vld [vmem:[#allocation9 + $0x380] sm:$0xff] }
  0x70   :  { %557 = vmatpush1.bf16.msra.mxu1 %v556_v58  ;;  %v196_v43 = vld [vmem:[#allocation9 + $0x3a0] sm:$0xff]  ;;  %v201_v44 = vld [vmem:[#allocation9 + $0x3c8] sm:$0xff]  ;;  %v572_v45 = vpack.c.bf16 %v182_v37, %v178_v36  ;;  %v574_v47 = vpack.c.bf16 %v191_v39, %v187_v38  ;;  %v186_v48 = vld [vmem:[#allocation9 + $0x350] sm:$0xff] }
  0x71   :  { %559 = vmatprep.subr.bf16.mxu1 %v558_v60  ;;  %305 = vmatprep.mubr.f32.mxu0 %v238_v27  ;;  %v205_v46 = vld [vmem:[#allocation9 + $0x3e8] sm:$0xff]  ;;  %v190_v49 = vld [vmem:[#allocation9 + $0x370] sm:$0xff]  ;;  %v195_v50 = vld [vmem:[#allocation9 + $0x398] sm:$0xff] }
  0x72   :  { %497 = vmatpush1.bf16.msra.mxu0 %v496_v52  ;;  %376 = vmatprep.mubr.f32.mxu1 %v238_v27  ;;  %v199_v51 = vld [vmem:[#allocation9 + $0x3b8] sm:$0xff]  ;;  %v516_v52 = vpack.c.bf16 %v196_v43, %v192_v42  ;;  %v518_v53 = vpack.c.bf16 %v205_v46, %v201_v44  ;;  %v200_v54 = vld [vmem:[#allocation9 + $0x3c0] sm:$0xff]  ;;  %v576_v56 = vpack.c.bf16 %v190_v49, %v186_v48  ;;  %v194_v58 = vld [vmem:[#allocation9 + $0x390] sm:$0xff] }
  0x73   :  { %499 = vmatprep.subr.bf16.mxu0 %v498_v55  ;;  %v204_v55 = vld [vmem:[#allocation9 + $0x3e0] sm:$0xff]  ;;  %v578_v57 = vpack.c.bf16 %v199_v51, %v195_v50  ;;  %v198_v59 = vld [vmem:[#allocation9 + $0x3b0] sm:$0xff]  ;;  %v203_v60 = vld [vmem:[#allocation9 + $0x3d8] sm:$0xff] }
  0x74   :  { %561 = vmatpush1.bf16.msra.mxu1 %v560_v7  ;;  %v207_v61 = vld [vmem:[#allocation9 + $0x3f8] sm:$0xff]  ;;  %v520_v62 = vpack.c.bf16 %v204_v55, %v200_v54  ;;  %v580_v63 = vpack.c.bf16 %v198_v59, %v194_v58  ;;  %v202_v1 = vld [vmem:[#allocation9 + $0x3d0] sm:$0xff]  ;;  %v212_v7 = vsub.s32 0, %v211_v6  ;;  %v411_v43 = vld [vmem:[#allocation10 + $0x1] ss:$0 sm:$0xff] }
  0x75   :  { %563 = vmatprep.subr.bf16.mxu1 %v562_v9  ;;  %v582_v0 = vpack.c.bf16 %v207_v61, %v203_v60  ;;  %v75_v4 = vld [vmem:[#allocation7 + $0x2] sm:$0x3]  ;;  %v208_v8 = vld [vmem:[#allocation10] ss:$8 sm:$0xf]  ;;  %v216_v9 = vsub.s32 1, %v211_v6 }
  0x76   :  { %501 = vmatpush1.bf16.msra.mxu0 %v500_v2  ;;  %v206_v2 = vld [vmem:[#allocation9 + $0x3f0] sm:$0xff]  ;;  %76 = vst [vmem:[#allocation3] sm:$0x3] %v75_v4  ;;  %v213_v10 = vrot.slane %v208_v8, %v212_v7  ;;  %v225_v18 = vrot.slane %v208_v8, %v224_v12 }
  0x77   :  { %503 = vmatprep.subr.bf16.mxu0 %v502_v3  ;;  %v584_v3 = vpack.c.bf16 %v206_v2, %v202_v1  ;;  %v217_v11 = vrot.slane %v208_v8, %v216_v9 }
  0x78   :  { %565 = vmatpush1.bf16.msra.mxu1 %v564_v20  ;;  %v220_v20 = vsub.s32 2, %v211_v6 }
  0x79   :  { %567 = vmatprep.subr.bf16.mxu1 %v566_v21 }
  0x7a   :  { %505 = vmatpush1.bf16.msra.mxu0 %v504_v14 }
  0x7b   :  { %507 = vmatprep.subr.bf16.mxu0 %v506_v16 }
  0x7c   :  { %569 = vmatpush1.bf16.msra.mxu1 %v568_v33 }
  0x7d   :  { %571 = vmatprep.subr.bf16.mxu1 %v570_v35  ;;  %v402_v33 = vld [vmem:[#allocation3] sm:$0x3] }
  0x7e   :  { %509 = vmatpush1.bf16.msra.mxu0 %v508_v28 }
  0x7f   :  { %511 = vmatprep.subr.bf16.mxu0 %v510_v29 }
  0x80   :  { %573 = vmatpush1.bf16.msra.mxu1 %v572_v45 }
  0x81   :  { %575 = vmatprep.subr.bf16.mxu1 %v574_v47 }
  0x82   :  { %513 = vmatpush1.bf16.msra.mxu0 %v512_v40 }
  0x83   :  { %515 = vmatprep.subr.bf16.mxu0 %v514_v41 }
  0x84   :  { %577 = vmatpush1.bf16.msra.mxu1 %v576_v56 }
  0x85   :  { %579 = vmatprep.subr.bf16.mxu1 %v578_v57 }
  0x86   :  { %517 = vmatpush1.bf16.msra.mxu0 %v516_v52 }
  0x87   :  { %519 = vmatprep.subr.bf16.mxu0 %v518_v53 }
  0x88   :  { %581 = vmatpush1.bf16.msra.mxu1 %v580_v63 }
  0x89   :  { %583 = vmatprep.subr.bf16.mxu1 %v582_v0 }
  0x8a   :  { %521 = vmatpush1.bf16.msra.mxu0 %v520_v62 }
  0x8c   :  { %585 = vmatpush1.bf16.msra.mxu1 %v584_v3 }
  0x8d   :  { %306 = vmatmul.mubr.f32.vlgmr.msra.gmra.mrb[0].mxu0 %v816_v24 }
  0x8f   :  { %377 = vmatmul.mubr.f32.vlgmr.msra.gmra.mrb[0].mxu1 %v816_v24  ;;  %v221_v24 = vrot.slane %v208_v8, %v220_v20 }
 0x160   :  { %v307_v13 = vpop.f32.mrb[0].mxu0 }
 0x161   :  { %v308_v14 = vadd.f32 %v307_v13, %v213_v10  ;;  %v309_v15 = vpop.f32.mrb[1].mxu0 }
 0x162   :  { %v310_v16 = vadd.f32 %v309_v15, %v217_v11  ;;  %v378_v21 = vpop.f32.mrb[0].mxu1 }
 0x163   :  { %v454_v17 = vmul.f32 -1.442695, %v308_v14  ;;  %v380_v22 = vpop.f32.mrb[1].mxu1  ;;  %v379_v26 = vadd.f32 %v378_v21, %v221_v24 }
 0x164   :  { %v455_v19 = vmul.f32 -1.442695, %v310_v16  ;;  %v381_v23 = vadd.f32 %v380_v22, %v225_v18 }
 0x165   :  { %593 = vpow2.f32 %v454_v17 }
 0x166   :  { %595 = vpow2.f32 %v455_v19  ;;  %v456_v25 = vmul.f32 -1.442695, %v381_v23 }
 0x168   :  { %597 = vpow2.f32 %v456_v25 }
 0x169   :  { %599 = vtanh.f32 %v379_v26 }
 0x16f   :  { %v594_v27 = vpop.eup %593 }
 0x170   :  { %v596_v28 = vpop.eup %595  ;;  %v386_v29 = vadd.f32 1.0, %v594_v27 }
 0x171   :  { %v392_v30 = vadd.f32 1.0, %v596_v28 }
 0x172   :  { %601 = vrcp.f32 %v386_v29  ;;  %v598_v31 = vpop.eup %597 }
 0x173   :  { %603 = vrcp.f32 %v392_v30  ;;  %v600_v32 = vpop.eup %599  ;;  %v399_v35 = vadd.f32 1.0, %v598_v31 }
 0x175   :  { %605 = vrcp.f32 %v399_v35 }
 0x17c   :  { %v602_v34 = vpop.eup %601 }
 0x17d   :  { %v604_v36 = vpop.eup %603  ;;  %v404_v37 = vmul.f32 %v602_v34, %v600_v32 }
 0x17e   :  { %v403_v38 = vmul.f32 %v604_v36, %v402_v33 }
 0x17f   :  { %v606_v40 = vpop.eup %605 }
 0x180   :  { %v405_v39 = vadd.f32 %v404_v37, %v403_v38 }
 0x182   :  { %607 = vtanh.f32 %v405_v39  ;;  %408 = vst [vmem:[#allocation3] sm:$0x3] %v405_v39  ;;  %431 = vst [vmem:[#allocation12 + $0x2] sm:$0x3] %v405_v39 }
 0x18c   :  { %v608_v41 = vpop.eup %607 }
 0x18d   :  { %v407_v42 = vmul.f32 %v608_v41, %v606_v40 }
 0x18f   :  { %409 = vst [vmem:[#allocation2 + $0x2] sm:$0x3] %v407_v42  ;;  %v410_v44 = vmax.f32 %v407_v42, 0.0  ;;  %430 = vst [vmem:[#allocation12] sm:$0x3] %v407_v42 }
 0x191   :  { %v412_v45 = vmul.f32 %v411_v43, %v410_v44 }
 0x193   :  { %v414_v46 = vsel %vm413_vm0, %v412_v45, 0.0 }
 0x194   :  { %415 = vadd.xlane.f32.xlu0 %v414_v46 }
 0x195   :  { %712 = shalt.err (!%p709_p8)
}
 0x196   :  { %s713_s18 = scalar_lea.hbm %s842_s5, 64 }
 0x197   :  { %p714_p9 = scmp.ne.s32.totalorder %s842_s5, %s713_s18  ;;  %p717_p10 = scmp.lt.u32.totalorder %s713_s18, %s842_s5 }
 0x199   :  { %p719_p11 = pnand %p717_p10, %p714_p9 }
 0x19b   :  { %722 = shalt.err (!%p719_p11)
}
 0x19c   :  { %443 = dma.vmem_to_hbm [thread:$0]  %s441_s1, 64, %s842_s5, [#allocation6]   ;;  %v417_v47 = vld [vmem:[#allocation10 + $0x2] ss:$0 sm:$0xff]  ;;  %vm425_vm1 = vcmask 1024  }
 0x221   :  { %v416_v48 = vpop.xlane.xlu0 %415 }
 0x222   :  { %v418_v49 = vadd.f32 %v417_v47, %v416_v48 }
 0x224   :  { %v457_v50 = vmul.f32 -1.442695, %v418_v49 }
 0x226   :  { %609 = vpow2.f32 %v457_v50 }
 0x230   :  { %v610_v51 = vpop.eup %609 }
 0x231   :  { %v422_v52 = vadd.f32 1.0, %v610_v51 }
 0x233   :  { %611 = vrcp.f32 %v422_v52 }
 0x23d   :  { %v612_v53 = vpop.eup %611 }
 0x23e   :  { %426 = vst.msk [vmem:[%s841_s4] sm:$0x3] %vm425_vm1, %v612_v53 }
 0x23f   :  { %729 = dma.done.wait [#allocation6], 64  }
 0x240   :  { %730 = vsyncadd [#allocation6], 4294967232 }
 0x241   :  { %449 = vsyncpa [#allocation5], 1 }
 0x242   :  { %450 = vsyncpa [#allocation8], 1 }
 0x243   :  { %451 = vsyncpa [#allocation11], 1 }
 0x244   :  { %452 = vsyncpa [#allocation6], 1 }

</bundles_post_ra>
